<compile_context>
chip_gen: v6e
topology: v6e:2x2x1
jax: 0.10.0
libtpu: 0.0.40
codegen_flags: <defaults>
</compile_context>

<pallas_src>
import jax
import jax.numpy as jnp
from jax.experimental import pallas as pl
from jax.experimental.pallas import tpu as pltpu


def mlp_kernel(x_ref, w1_ref, b1_ref, w2_ref, b2_ref, w3_ref, b3_ref, o_ref):
    # layer1: (tm, in) @ (in, h1); bf16 operands, f32 accumulation on the MXU.
    h1 = jnp.dot(x_ref[...], w1_ref[...], preferred_element_type=jnp.float32)
    h1 = h1 + b1_ref[...]
    # layer2: cast activation back to bf16 for the MXU, keep f32 accumulation.
    h2 = jnp.dot(h1.astype(jnp.bfloat16), w2_ref[...],
                 preferred_element_type=jnp.float32)
    h2 = h2 + b2_ref[...]
    # layer3: lane-dense (padded) output slab.
    out = jnp.dot(h2.astype(jnp.bfloat16), w3_ref[...],
                  preferred_element_type=jnp.float32)
    out = out + b3_ref[...]
    o_ref[...] = out.astype(o_ref.dtype)


def _round_up(x, m):
    return (x + m - 1) // m * m


def simple_net_forward(x, params, *, tm_max=512):
    """params = (w1, b1, w2, b2, w3, b3); wi: [in, out], bi: [1, out]."""
    w1, b1, w2, b2, w3, b3 = params
    batch, in_dim = x.shape
    h1 = w1.shape[1]
    h2 = w2.shape[1]
    out_dim = w3.shape[1]
    out_dtype = x.dtype

    # --- layout: batch tile multiple of 16 (bf16 sublanes), lane-dense out ---
    tm = min(tm_max, _round_up(batch, 16))
    batch_p = _round_up(batch, tm)
    out_p = _round_up(out_dim, 128)

    # --- dtype: bf16 MXU operands, f32 biases / accumulation ---
    x_bf = jnp.pad(x.astype(jnp.bfloat16), ((0, batch_p - batch), (0, 0)))
    w1_bf = w1.astype(jnp.bfloat16)
    w2_bf = w2.astype(jnp.bfloat16)
    w3_bf = jnp.pad(w3.astype(jnp.bfloat16), ((0, 0), (0, out_p - out_dim)))
    b1_f = b1.astype(jnp.float32)
    b2_f = b2.astype(jnp.float32)
    b3_f = jnp.pad(b3.astype(jnp.float32), ((0, 0), (0, out_p - out_dim)))

    grid = (batch_p // tm,)
    flops = 2 * batch_p * (in_dim * h1 + h1 * h2 + h2 * out_p)
    bytes_accessed = (x_bf.size * 2 + w1_bf.size * 2 + w2_bf.size * 2
                      + w3_bf.size * 2 + (b1_f.size + b2_f.size + b3_f.size) * 4
                      + batch_p * out_p * jnp.dtype(out_dtype).itemsize)

    out_padded = pl.pallas_call(
        mlp_kernel,
        out_shape=jax.ShapeDtypeStruct((batch_p, out_p), out_dtype),
        grid=grid,
        in_specs=[
            pl.BlockSpec((tm, in_dim), lambda i: (i, 0)),   # x: tiled over batch
            pl.BlockSpec((in_dim, h1), lambda i: (0, 0)),   # W1: resident
            pl.BlockSpec((1, h1),      lambda i: (0, 0)),   # b1: resident
            pl.BlockSpec((h1, h2),     lambda i: (0, 0)),   # W2: resident
            pl.BlockSpec((1, h2),      lambda i: (0, 0)),   # b2: resident
            pl.BlockSpec((h2, out_p),  lambda i: (0, 0)),   # W3: resident
            pl.BlockSpec((1, out_p),   lambda i: (0, 0)),   # b3: resident
        ],
        out_specs=pl.BlockSpec((tm, out_p), lambda i: (i, 0)),
        compiler_params=pltpu.CompilerParams(
            dimension_semantics=("parallel",)),
        cost_estimate=pl.CostEstimate(flops=flops, transcendentals=0,
                                      bytes_accessed=bytes_accessed),
    )(x_bf, w1_bf, b1_f, w2_bf, b2_f, w3_bf, b3_f)

    return out_padded[:batch, :out_dim]


def init_linear(key, in_features, out_features, dtype=jnp.float32):
    """Deterministic init mimicking nn.Linear's uniform(-1/sqrt(in), 1/sqrt(in))."""
    kw, kb = jax.random.split(key)
    bound = 1.0 / (in_features ** 0.5)
    # Stored as [in, out] (transpose of PyTorch's [out, in]) for row-major matmul.
    w = jax.random.uniform(kw, (in_features, out_features), dtype,
                           minval=-bound, maxval=bound)
    b = jax.random.uniform(kb, (1, out_features), dtype,
                           minval=-bound, maxval=bound)
    return w, b


if __name__ == "__main__":
    # Small shapes consistent with simpleNet(in_dim, n_hidden_1, n_hidden_2, out_dim).
    batch, in_dim, n_hidden_1, n_hidden_2, out_dim = 8, 128, 256, 128, 64

    key = jax.random.PRNGKey(0)
    kx, k1, k2, k3 = jax.random.split(key, 4)

    x = jax.random.normal(kx, (batch, in_dim), jnp.float32)
    w1, b1 = init_linear(k1, in_dim, n_hidden_1)
    w2, b2 = init_linear(k2, n_hidden_1, n_hidden_2)
    w3, b3 = init_linear(k3, n_hidden_2, out_dim)
    params = (w1, b1, w2, b2, w3, b3)

    out = simple_net_forward(x, params)
    out = jax.block_until_ready(out)
    assert out.shape == (batch, out_dim)

    # Reference 1: same bf16-operand / f32-accumulation recipe (tight check).
    xb = x.astype(jnp.bfloat16)
    r1 = jnp.dot(xb, w1.astype(jnp.bfloat16),
                 preferred_element_type=jnp.float32) + b1
    r2 = jnp.dot(r1.astype(jnp.bfloat16), w2.astype(jnp.bfloat16),
                 preferred_element_type=jnp.float32) + b2
    ref_bf = jnp.dot(r2.astype(jnp.bfloat16), w3.astype(jnp.bfloat16),
                     preferred_element_type=jnp.float32) + b3
    assert jnp.allclose(out, ref_bf, atol=5e-3, rtol=5e-3)

    # Reference 2: pure f32 forward (semantics check, loose tol for bf16 MXU inputs).
    ref_f32 = ((x @ w1 + b1) @ w2 + b2) @ w3 + b3
    assert jnp.allclose(out, ref_f32, atol=7e-2, rtol=7e-2)

    print("KERNEL_OK")
</pallas_src>

<mosaic_0001>
module attributes {stable_mosaic.version = 11 : i64} {
  func.func @mlp_kernel(%arg0: i32, %arg1: memref<16x128xbf16, #tpu.memory_space<vmem>>, %arg2: memref<128x256xbf16, #tpu.memory_space<vmem>>, %arg3: memref<1x256xf32, #tpu.memory_space<vmem>>, %arg4: memref<256x128xbf16, #tpu.memory_space<vmem>>, %arg5: memref<1x128xf32, #tpu.memory_space<vmem>>, %arg6: memref<128x128xbf16, #tpu.memory_space<vmem>>, %arg7: memref<1x128xf32, #tpu.memory_space<vmem>>, %arg8: memref<16x128xf32, #tpu.memory_space<vmem>>) attributes {dimension_semantics = [#tpu.dimension_semantics<parallel>], iteration_bounds = array<i64: 1>, scalar_prefetch = 0 : i64, scratch_operands = 0 : i64, tpu.core_type = #tpu.core_type<tc>, window_params = [{transform_indices = @transform_0, window_bounds = array<i64: 16, 128>}, {pipeline_mode = #tpu.pipeline_mode<synchronous>, transform_indices = @transform_1, window_bounds = array<i64: 128, 256>}, {pipeline_mode = #tpu.pipeline_mode<synchronous>, transform_indices = @transform_2, window_bounds = array<i64: 1, 256>}, {pipeline_mode = #tpu.pipeline_mode<synchronous>, transform_indices = @transform_3, window_bounds = array<i64: 256, 128>}, {pipeline_mode = #tpu.pipeline_mode<synchronous>, transform_indices = @transform_4, window_bounds = array<i64: 1, 128>}, {pipeline_mode = #tpu.pipeline_mode<synchronous>, transform_indices = @transform_5, window_bounds = array<i64: 128, 128>}, {pipeline_mode = #tpu.pipeline_mode<synchronous>, transform_indices = @transform_6, window_bounds = array<i64: 1, 128>}, {transform_indices = @transform_7, window_bounds = array<i64: 16, 128>}]} {
    %c0 = arith.constant 0 : index
    %c0_0 = arith.constant 0 : index
    %0 = vector.load %arg1[%c0, %c0_0] : memref<16x128xbf16, #tpu.memory_space<vmem>>, vector<16x128xbf16>
    %c0_1 = arith.constant 0 : index
    %c0_2 = arith.constant 0 : index
    %1 = vector.load %arg2[%c0_1, %c0_2] : memref<128x256xbf16, #tpu.memory_space<vmem>>, vector<128x256xbf16>
    %cst = arith.constant dense<0.000000e+00> : vector<16x256xf32>
    %2 = tpu.matmul %0, %1, %cst {dimension_numbers = #tpu.dot_dimension_numbers<[1], [0], [0], [1], [0, 0, 1, 1], [], []>} : vector<16x128xbf16>, vector<128x256xbf16>, vector<16x256xf32> -> vector<16x256xf32>
    %c0_3 = arith.constant 0 : index
    %c0_4 = arith.constant 0 : index
    %3 = vector.load %arg3[%c0_3, %c0_4] : memref<1x256xf32, #tpu.memory_space<vmem>>, vector<1x256xf32>
    %4 = vector.broadcast %3 : vector<1x256xf32> to vector<16x256xf32>
    %5 = arith.addf %2, %4 : vector<16x256xf32>
    %6 = arith.truncf %5 : vector<16x256xf32> to vector<16x256xbf16>
    %c0_5 = arith.constant 0 : index
    %c0_6 = arith.constant 0 : index
    %7 = vector.load %arg4[%c0_5, %c0_6] : memref<256x128xbf16, #tpu.memory_space<vmem>>, vector<256x128xbf16>
    %cst_7 = arith.constant dense<0.000000e+00> : vector<16x128xf32>
    %8 = tpu.matmul %6, %7, %cst_7 {dimension_numbers = #tpu.dot_dimension_numbers<[1], [0], [0], [1], [0, 0, 1, 1], [], []>} : vector<16x256xbf16>, vector<256x128xbf16>, vector<16x128xf32> -> vector<16x128xf32>
    %c0_8 = arith.constant 0 : index
    %c0_9 = arith.constant 0 : index
    %9 = vector.load %arg5[%c0_8, %c0_9] : memref<1x128xf32, #tpu.memory_space<vmem>>, vector<1x128xf32>
    %10 = vector.broadcast %9 : vector<1x128xf32> to vector<16x128xf32>
    %11 = arith.addf %8, %10 : vector<16x128xf32>
    %12 = arith.truncf %11 : vector<16x128xf32> to vector<16x128xbf16>
    %c0_10 = arith.constant 0 : index
    %c0_11 = arith.constant 0 : index
    %13 = vector.load %arg6[%c0_10, %c0_11] : memref<128x128xbf16, #tpu.memory_space<vmem>>, vector<128x128xbf16>
    %cst_12 = arith.constant dense<0.000000e+00> : vector<16x128xf32>
    %14 = tpu.matmul %12, %13, %cst_12 {dimension_numbers = #tpu.dot_dimension_numbers<[1], [0], [0], [1], [0, 0, 1, 1], [], []>} : vector<16x128xbf16>, vector<128x128xbf16>, vector<16x128xf32> -> vector<16x128xf32>
    %c0_13 = arith.constant 0 : index
    %c0_14 = arith.constant 0 : index
    %15 = vector.load %arg7[%c0_13, %c0_14] : memref<1x128xf32, #tpu.memory_space<vmem>>, vector<1x128xf32>
    %16 = vector.broadcast %15 : vector<1x128xf32> to vector<16x128xf32>
    %17 = arith.addf %14, %16 : vector<16x128xf32>
    %c0_15 = arith.constant 0 : index
    %c0_16 = arith.constant 0 : index
    %18 = vector.load %arg8[%c0_15, %c0_16] : memref<16x128xf32, #tpu.memory_space<vmem>>, vector<16x128xf32>
    tpu.vector_store %arg8[%c0_15, %c0_16], %17 {strides = array<i32>} : memref<16x128xf32, #tpu.memory_space<vmem>>, vector<16x128xf32>,
    return
  }
  func.func @transform_0(%arg0: i32) -> (i32, i32) {
    %c0_i32 = arith.constant 0 : i32
    %c0_i32_0 = arith.constant 0 : i32
    return %arg0, %c0_i32 : i32, i32
  }
  func.func @transform_1(%arg0: i32) -> (i32, i32) {
    %c0_i32 = arith.constant 0 : i32
    %c0_i32_0 = arith.constant 0 : i32
    %c0_i32_1 = arith.constant 0 : i32
    return %c0_i32, %c0_i32_0 : i32, i32
  }
  func.func @transform_2(%arg0: i32) -> (i32, i32) {
    %c0_i32 = arith.constant 0 : i32
    %c0_i32_0 = arith.constant 0 : i32
    %c0_i32_1 = arith.constant 0 : i32
    return %c0_i32, %c0_i32_0 : i32, i32
  }
  func.func @transform_3(%arg0: i32) -> (i32, i32) {
    %c0_i32 = arith.constant 0 : i32
    %c0_i32_0 = arith.constant 0 : i32
    %c0_i32_1 = arith.constant 0 : i32
    return %c0_i32, %c0_i32_0 : i32, i32
  }
  func.func @transform_4(%arg0: i32) -> (i32, i32) {
    %c0_i32 = arith.constant 0 : i32
    %c0_i32_0 = arith.constant 0 : i32
    %c0_i32_1 = arith.constant 0 : i32
    return %c0_i32, %c0_i32_0 : i32, i32
  }
  func.func @transform_5(%arg0: i32) -> (i32, i32) {
    %c0_i32 = arith.constant 0 : i32
    %c0_i32_0 = arith.constant 0 : i32
    %c0_i32_1 = arith.constant 0 : i32
    return %c0_i32, %c0_i32_0 : i32, i32
  }
  func.func @transform_6(%arg0: i32) -> (i32, i32) {
    %c0_i32 = arith.constant 0 : i32
    %c0_i32_0 = arith.constant 0 : i32
    %c0_i32_1 = arith.constant 0 : i32
    return %c0_i32, %c0_i32_0 : i32, i32
  }
  func.func @transform_7(%arg0: i32) -> (i32, i32) {
    %c0_i32 = arith.constant 0 : i32
    %c0_i32_0 = arith.constant 0 : i32
    return %arg0, %c0_i32 : i32, i32
  }
}

</mosaic_0001>

<bundles_post_ra>
// kernel: tpu_custom_call.1
= control target key start
LH: loop header
LB: loop body
LE: loop exit
PB: predicated region body
PF: predicated region fallthrough
CT: control target
= control target key end

     0   :  { %12 = vsyncpa [#allocation3], 0  ;;  %s899_s0 = inlined_call_operand.hbm [shape: bf16[16,128], index: 0, kind: input, shape index: {}]   ;;  %s900_s1 = inlined_call_operand.hbm [shape: bf16[128,256], index: 1, kind: input, shape index: {}]   ;;  %s901_s2 = inlined_call_operand.vmem [shape: f32[1,256], index: 2, kind: input, shape index: {}]   ;;  %s902_s3 = inlined_call_operand.hbm [shape: bf16[256,128], index: 3, kind: input, shape index: {}]   ;;  %s903_s4 = inlined_call_operand.vmem [shape: f32[1,128], index: 4, kind: input, shape index: {}]   ;;  %s904_s5 = inlined_call_operand.hbm [shape: bf16[128,128], index: 5, kind: input, shape index: {}]   ;;  %s905_s6 = inlined_call_operand.vmem [shape: f32[1,128], index: 6, kind: input, shape index: {}]   ;;  %s906_s7 = inlined_call_operand.hbm [shape: f32[16,128], index: 7, kind: output, shape index: {}]  }
   0x1   :  { %13 = vsyncpa [#allocation6], 0 }
   0x2   :  { %14 = vsyncpa [#allocation9], 0 }
   0x3   :  { %15 = vsyncpa [#allocation4], 0  ;;  %s817_s24 = smov [#allocation5]  }
   0x4   :  { %s33_s25 = sshll.u32 %s817_s24, 4  ;;  %s34_s25 = int_to_ptr.vmem [resolvable:$true] %s33_s25 }
   0x5   :  { %s717_s26 = scalar_lea.vmem %s34_s25, 2048  ;;  %p722_p1 = scmp.lt.s32.totalorder %s34_s25, %s34_s25 }
   0x6   :  { %p718_p0 = scmp.ne.s32.totalorder %s34_s25, %s717_s26  ;;  %p723_p2 = scmp.lt.s32.totalorder %s717_s26, %s717_s26 }
   0x8   :  { %p724_p3 = por %p723_p2, %p722_p1 }
   0xa   :  { %p725_p4 = pnand %p724_p3, %p718_p0 }
   0xc   :  { %728 = shalt.err (!%p725_p4)
}
   0xd   :  { %s818_s27 = smov 128   ;;  %s819_s28 = smov 8  }
   0xe   :  { %39 = dma.hbm_to_vmem [thread:$0]  %s900_s1, 2048, %s34_s25, [#allocation6], %s818_s27, %s818_s27, %s819_s28  }
   0xf   :  { %s820_s8 = smov [#allocation2]  }
  0x10   :  { %s21_s9 = sshll.u32 %s820_s8, 4  ;;  %s22_s9 = int_to_ptr.vmem [resolvable:$true] %s21_s9 }
  0x11   :  { %s737_s10 = scalar_lea.vmem %s22_s9, 128  ;;  %p742_p6 = scmp.lt.s32.totalorder %s22_s9, %s22_s9 }
  0x12   :  { %p738_p5 = scmp.ne.s32.totalorder %s22_s9, %s737_s10  ;;  %p743_p7 = scmp.lt.s32.totalorder %s737_s10, %s737_s10 }
  0x14   :  { %p744_p8 = por %p743_p7, %p742_p6 }
  0x16   :  { %p745_p9 = pnand %p744_p8, %p738_p5 }
  0x18   :  { %748 = shalt.err (!%p745_p9)
}
  0x19   :  { %s821_s11 = smov 64   ;;  %s822_s12 = smov 4  }
  0x1a   :  { %27 = dma.hbm_to_vmem [thread:$0]  %s899_s0, 128, %s22_s9, [#allocation3], %s821_s11, %s821_s11, %s822_s12  }
  0x1b   :  { %s823_s15 = smov [#allocation7]   ;;  %s824_s17 = smov [#allocation8]  }
  0x1c   :  { %s47_s16 = sshll.u32 %s823_s15, 4  ;;  %s61_s1 = sshll.u32 %s824_s17, 4  ;;  %s48_s16 = int_to_ptr.vmem [resolvable:$true] %s47_s16  ;;  %s62_s1 = int_to_ptr.vmem [resolvable:$true] %s61_s1 }
  0x1d   :  { %s757_s18 = scalar_lea.vmem %s48_s16, 2048  ;;  %p762_p11 = scmp.lt.s32.totalorder %s48_s16, %s48_s16 }
  0x1e   :  { %p758_p10 = scmp.ne.s32.totalorder %s48_s16, %s757_s18  ;;  %p763_p12 = scmp.lt.s32.totalorder %s757_s18, %s757_s18 }
  0x20   :  { %p764_p13 = por %p763_p12, %p762_p11 }
  0x22   :  { %p765_p0 = pnand %p764_p13, %p758_p10 }
  0x24   :  { %768 = shalt.err (!%p765_p0)
}
  0x25   :  { %53 = dma.hbm_to_vmem [thread:$0]  %s902_s3, 2048, %s48_s16, [#allocation6], %s821_s11, %s821_s11, %s822_s12  }
  0x26   :  { %s777_s21 = scalar_lea.vmem %s62_s1, 1024  ;;  %p782_p2 = scmp.lt.s32.totalorder %s62_s1, %s62_s1 }
  0x27   :  { %p778_p1 = scmp.ne.s32.totalorder %s62_s1, %s777_s21  ;;  %p783_p3 = scmp.lt.s32.totalorder %s777_s21, %s777_s21 }
  0x29   :  { %p784_p4 = por %p783_p3, %p782_p2 }
  0x2b   :  { %p785_p5 = pnand %p784_p4, %p778_p1 }
  0x2d   :  { %788 = shalt.err (!%p785_p5)
}
  0x2e   :  { %67 = dma.hbm_to_vmem [thread:$0]  %s904_s5, 1024, %s62_s1, [#allocation9], %s821_s11, %s821_s11, %s822_s12  }
  0x2f   :  { %809 = dma.done.wait [#allocation3], 128  }
  0x30   :  { %810 = vsyncadd [#allocation3], 4294967168 }
  0x31   :  { %811 = dma.done.wait [#allocation6], 4096  }
  0x32   :  { %812 = vsyncadd [#allocation6], 4294963200 }
  0x33   :  { %813 = dma.done.wait [#allocation9], 1024  }
  0x34   :  { %814 = vsyncadd [#allocation9], 4294966272  ;;  %v825_v0 = vmov 0   ;;  %v660_v1 = vld [vmem:[#allocation5 + $0x74] ss:$8 sps:$4 sm:$0xff]   ;;  %v689_v16 = vld [vmem:[#allocation7 + $0x68] sm:$0xff]   ;;  %v103_v40 = vlaneseq }
  0x35   :  { %231 = vmatprep.mubr.bf16.mxu0 %v825_v0  ;;  %v662_v2 = vld [vmem:[#allocation5 + $0x70] ss:$8 sps:$4 sm:$0xff]   ;;  %199 = vmatprep.subr.bf16.mxu0 %v660_v1  ;;  %v663_v3 = vld [vmem:[#allocation5 + $0x64] ss:$8 sps:$4 sm:$0xff]   ;;  %v665_v4 = vld [vmem:[#allocation5 + $0x60] ss:$8 sps:$4 sm:$0xff]  }
  0x36   :  { %200 = vmatpush1.bf16.msra.mxu0 %v662_v2  ;;  %v666_v5 = vld [vmem:[#allocation5 + $0x54] ss:$8 sps:$4 sm:$0xff]   ;;  %v668_v6 = vld [vmem:[#allocation5 + $0x50] ss:$8 sps:$4 sm:$0xff]   ;;  %v669_v7 = vld [vmem:[#allocation5 + $0x44] ss:$8 sps:$4 sm:$0xff]  }
  0x37   :  { %201 = vmatprep.subr.bf16.mxu0 %v663_v3  ;;  %v671_v8 = vld [vmem:[#allocation5 + $0x40] ss:$8 sps:$4 sm:$0xff]   ;;  %v672_v9 = vld [vmem:[#allocation5 + $0x34] ss:$8 sps:$4 sm:$0xff]   ;;  %v674_v11 = vld [vmem:[#allocation5 + $0x30] ss:$8 sps:$4 sm:$0xff]  }
  0x38   :  { %v685_v10 = vld [vmem:[#allocation7 + $0x78] sm:$0xff]   ;;  %v675_v13 = vld [vmem:[#allocation5 + $0x24] ss:$8 sps:$4 sm:$0xff]   ;;  %v687_v14 = vld [vmem:[#allocation7 + $0x70] sm:$0xff]   ;;  %v826_v35 = vmov 0.0   ;;  %v104_v41 = vshrl.u32 %v103_v40, 7 }
  0x39   :  { %v686_v12 = vld [vmem:[#allocation7 + $0x38] sm:$0xff]   ;;  %597 = vmatprep.subr.bf16.mxu1 %v685_v10  ;;  %v688_v15 = vld [vmem:[#allocation7 + $0x30] sm:$0xff]   ;;  %v677_v17 = vld [vmem:[#allocation5 + $0x20] ss:$8 sps:$4 sm:$0xff]   ;;  %vm827_vm0 = vmmov 0   ;;  %s828_s26 = smov [#allocation10]  }
  0x3a   :  { %202 = vmatpush1.bf16.msra.mxu0 %v665_v4  ;;  %598 = vmatpush3.bf16.msra.mxu1 %v686_v12  ;;  %v678_v18 = vld [vmem:[#allocation5 + $0x14] ss:$8 sps:$4 sm:$0xff]   ;;  %v690_v19 = vld [vmem:[#allocation7 + $0x28] sm:$0xff]   ;;  %v691_v20 = vld [vmem:[#allocation7 + $0x60] sm:$0xff]   ;;  %v109_v42 = vsub.s32 1, %v104_v41  ;;  %v105_v43 = vsub.s32 0, %v104_v41 }
  0x3b   :  { %203 = vmatprep.subr.bf16.mxu0 %v666_v5  ;;  %599 = vmatprep.subr.bf16.mxu1 %v687_v14  ;;  %v680_v21 = vld [vmem:[#allocation5 + $0x10] ss:$8 sps:$4 sm:$0xff]   ;;  %v692_v22 = vld [vmem:[#allocation7 + $0x20] sm:$0xff]   ;;  %v697_v30 = vld [vmem:[#allocation7 + $0x48] sm:$0xff]   ;;  %s540_s29 = sshll.u32 %s828_s26, 4  ;;  %s541_s29 = int_to_ptr.vmem [resolvable:$true] %s540_s29 }
  0x3c   :  { %v681_v23 = vld [vmem:[#allocation5 + $0x4] ss:$8 sps:$4 sm:$0xff]   ;;  %v693_v24 = vld [vmem:[#allocation7 + $0x58] sm:$0xff]   ;;  %v683_v25 = vld [vmem:[#allocation5] ss:$8 sps:$4 sm:$0xff]   ;;  %p794_p7 = scmp.lt.s32.totalorder %s541_s29, %s541_s29 }
  0x3d   :  { %v694_v26 = vld [vmem:[#allocation7 + $0x18] sm:$0xff]   ;;  %v695_v28 = vld [vmem:[#allocation7 + $0x50] sm:$0xff]   ;;  %v698_v31 = vld [vmem:[#allocation7 + $0x8] sm:$0xff]  }
  0x3e   :  { %204 = vmatpush1.bf16.msra.mxu0 %v668_v6  ;;  %600 = vmatpush3.bf16.msra.mxu1 %v688_v15  ;;  %v684_v27 = vld [vmem:[#allocation2] sm:$0xff]   ;;  %v696_v29 = vld [vmem:[#allocation7 + $0x10] sm:$0xff]   ;;  %v699_v32 = vld [vmem:[#allocation7 + $0x40] sm:$0xff]  }
  0x3f   :  { %205 = vmatprep.subr.bf16.mxu0 %v669_v7  ;;  %601 = vmatprep.subr.bf16.mxu1 %v689_v16  ;;  %v700_v33 = vld [vmem:[#allocation7] sm:$0xff]   ;;  %v701_v34 = vld [vmem:[#allocation8 + $0x38] sm:$0xff]   ;;  %v702_v36 = vld [vmem:[#allocation8 + $0x30] sm:$0xff]  }
  0x40   :  { %v703_v37 = vld [vmem:[#allocation8 + $0x28] sm:$0xff]   ;;  %v704_v38 = vld [vmem:[#allocation8 + $0x20] sm:$0xff]   ;;  %v705_v39 = vld [vmem:[#allocation8 + $0x18] sm:$0xff]  }
  0x41   :  { %v101_v45 = vld [vmem:[%s901_s2] sm:$0x3]  ;;  %v706_v57 = vld [vmem:[#allocation8 + $0x10] sm:$0xff]   ;;  %v707_v58 = vld [vmem:[#allocation8 + $0x8] sm:$0xff]  }
  0x42   :  { %206 = vmatpush1.bf16.msra.mxu0 %v671_v8  ;;  %602 = vmatpush3.bf16.msra.mxu1 %v690_v19  ;;  %v110_v47 = vrot.slane %v101_v45, %v109_v42  ;;  %v106_v48 = vrot.slane %v101_v45, %v105_v43  ;;  %v708_v59 = vld [vmem:[#allocation8] sm:$0xff]   ;;  %v571_v0 = vld [vmem:[%s903_s4] ss:$0 sm:$0xff]  ;;  %s789_s4 = scalar_lea.vmem %s541_s29, 256 }
  0x43   :  { %207 = vmatprep.subr.bf16.mxu0 %v672_v9  ;;  %603 = vmatprep.subr.bf16.mxu1 %v691_v20  ;;  %v588_v6 = vld [vmem:[%s905_s6] ss:$0 sm:$0xff]  ;;  %p790_p6 = scmp.ne.s32.totalorder %s541_s29, %s789_s4  ;;  %p795_p8 = scmp.lt.s32.totalorder %s789_s4, %s789_s4 }
  0x45   :  { %p796_p9 = por %p795_p8, %p794_p7 }
  0x46   :  { %208 = vmatpush1.bf16.msra.mxu0 %v674_v11  ;;  %604 = vmatpush3.bf16.msra.mxu1 %v692_v22 }
  0x47   :  { %209 = vmatprep.subr.bf16.mxu0 %v675_v13  ;;  %605 = vmatprep.subr.bf16.mxu1 %v693_v24  ;;  %p797_p10 = pnand %p796_p9, %p790_p6 }
  0x4a   :  { %210 = vmatpush1.bf16.msra.mxu0 %v677_v17  ;;  %606 = vmatpush3.bf16.msra.mxu1 %v694_v26 }
  0x4b   :  { %211 = vmatprep.subr.bf16.mxu0 %v678_v18  ;;  %607 = vmatprep.subr.bf16.mxu1 %v695_v28 }
  0x4e   :  { %212 = vmatpush1.bf16.msra.mxu0 %v680_v21  ;;  %608 = vmatpush3.bf16.msra.mxu1 %v696_v29 }
  0x4f   :  { %213 = vmatprep.subr.bf16.mxu0 %v681_v23  ;;  %609 = vmatprep.subr.bf16.mxu1 %v697_v30 }
  0x52   :  { %214 = vmatpush1.bf16.msra.mxu0 %v683_v25  ;;  %610 = vmatpush3.bf16.msra.mxu1 %v698_v31 }
  0x53   :  { %611 = vmatprep.subr.bf16.mxu1 %v699_v32  ;;  %628 = vmatprep.subr.bf16.mxu0 %v826_v35 }
  0x55   :  { %232 = vmatmul.mubr.bf16.vlgmr.msra.gmra.mxu0 %v684_v27 }
  0x56   :  { %612 = vmatpush3.bf16.msra.mxu1 %v700_v33  ;;  %629 = vmatpush3.bf16.msra.mxu0 %v701_v34 }
  0x57   :  { %630 = vmatprep.subr.bf16.mxu0 %v826_v35  ;;  %644 = vmatprep.mubr.msk.bf16.mxu0 %vm827_vm0, %v826_v35 }
  0x5a   :  { %631 = vmatpush3.bf16.msra.mxu0 %v702_v36 }
  0x5b   :  { %632 = vmatprep.subr.bf16.mxu0 %v826_v35 }
  0x5e   :  { %633 = vmatpush3.bf16.msra.mxu0 %v703_v37 }
  0x5f   :  { %634 = vmatprep.subr.bf16.mxu0 %v826_v35 }
  0x62   :  { %635 = vmatpush3.bf16.msra.mxu0 %v704_v38 }
  0x63   :  { %636 = vmatprep.subr.bf16.mxu0 %v826_v35 }
  0x66   :  { %637 = vmatpush3.bf16.msra.mxu0 %v705_v39 }
  0x67   :  { %638 = vmatprep.subr.bf16.mxu0 %v826_v35 }
  0x6a   :  { %639 = vmatpush3.bf16.msra.mxu0 %v706_v57 }
  0x6b   :  { %640 = vmatprep.subr.bf16.mxu0 %v826_v35 }
  0x6e   :  { %641 = vmatpush3.bf16.msra.mxu0 %v707_v58 }
  0x6f   :  { %642 = vmatprep.subr.bf16.mxu0 %v826_v35 }
  0x72   :  { %643 = vmatpush3.bf16.msra.mxu0 %v708_v59 }
 0x115   :  { %v233_v44 = vpop.f32.mrf.mxu0 }
 0x116   :  { %v234_v54 = vadd.f32 %v233_v44, %v106_v48 }
 0x117   :  { %v235_v46 = vpop.f32.mrf.mxu0 }
 0x118   :  { %v236_v52 = vadd.f32 %v235_v46, %v110_v47 }
 0x119   :  { %v237_v49 = vpop.f32.mrf.mxu0 }
 0x11a   :  { %v238_v50 = vadd.f32 %v237_v49, %v106_v48 }
 0x11b   :  { %v239_v51 = vpop.f32.mrf.mxu0 }
 0x11c   :  { %v240_v53 = vadd.f32 %v239_v51, %v110_v47  ;;  %v242_v56 = vpack.c.bf16 %v238_v50, %v234_v54 }
 0x11e   :  { %v243_v55 = vpack.c.bf16 %v240_v53, %v236_v52 }
 0x120   :  { %411 = vmatprep.mubr.bf16.mxu1 %v243_v55 }
 0x121   :  { %412 = vmatmul.mubr.bf16.vlgmr.msra.gmra.mxu1 %v242_v56 }
 0x1e1   :  { %v613_v60 = vpop.f32.mrf.mxu1 }
 0x1e3   :  { %v614_v61 = vpop.f32.mrf.mxu1 }
 0x1e4   :  { %v615_v63 = vadd.f32 %v614_v61, %v613_v60 }
 0x1e5   :  { %v616_v62 = vpop.f32.mrf.mxu1 }
 0x1e6   :  { %v414_v3 = vadd.f32 %v615_v63, %v571_v0 }
 0x1e7   :  { %v617_v1 = vpop.f32.mrf.mxu1 }
 0x1e8   :  { %v618_v2 = vadd.f32 %v617_v1, %v616_v62 }
 0x1ea   :  { %v417_v4 = vadd.f32 %v618_v2, %v571_v0 }
 0x1ec   :  { %v420_v5 = vpack.c.bf16 %v417_v4, %v414_v3 }
 0x1ee   :  { %645 = vmatmul.mubr.bf16.vlgmr.msra.gmra.mxu0 %v420_v5 }
 0x2ae   :  { %v526_v7 = vpop.f32.mrf.mxu0 }
 0x2af   :  { %v527_v8 = vadd.f32 %v588_v6, %v526_v7 }
 0x2b0   :  { %v646_v9 = vpop.f32.mrf.mxu0 }
 0x2b1   :  { %533 = vst [vmem:[#allocation10] sm:$0xff] %v527_v8 }
 0x2b2   :  { %v529_v10 = vpop.f32.mrf.mxu0 }
 0x2b3   :  { %v530_v11 = vadd.f32 %v588_v6, %v529_v10 }
 0x2b4   :  { %v647_v12 = vpop.f32.mrf.mxu0 }
 0x2b5   :  { %534 = vst [vmem:[#allocation10 + $0x8] sm:$0xff] %v530_v11 }
 0x2b6   :  { %800 = shalt.err (!%p797_p10)
}
 0x2b7   :  { %546 = dma.vmem_to_hbm [thread:$0]  %s541_s29, 256, %s906_s7, [#allocation4], %s818_s27, %s818_s27, %s819_s28  }
 0x2b8   :  { %815 = dma.done.wait [#allocation4], 256  }
 0x2b9   :  { %816 = vsyncadd [#allocation4], 4294967040 }
 0x2ba   :  { %550 = vsyncpa [#allocation3], 1 }
 0x2bb   :  { %551 = vsyncpa [#allocation6], 1 }
 0x2bc   :  { %552 = vsyncpa [#allocation9], 1 }
 0x2bd   :  { %553 = vsyncpa [#allocation4], 1 }

</bundles_post_ra>
